<compile_context>
chip_gen: v6e
topology: v6e:2x2x1
jax: 0.10.0
libtpu: 0.0.40
codegen_flags: <defaults>
</compile_context>

<pallas_src>
import functools

import jax
import jax.numpy as jnp
from jax.experimental import pallas as pl
from jax.experimental.pallas import tpu as pltpu


def _fold_group_sum(y, groups, width):
    """Sum `groups` adjacent lane-blocks of `width` cols: (R, groups*width) -> (R, width).

    Implemented as a log2(groups) tree of wide lane-slice adds instead of
    reshape(R, groups, width).sum(1), which would split the lane axis and force
    a full-tile VMEM relayout (flagged in the performance review).
    """
    if width == 1:
        # Global pooling over the whole lane axis (module default kernel=(4096,1), W=1).
        return jnp.sum(y, axis=-1, keepdims=True)
    extra = None
    while groups > 1:
        if groups % 2:
            tail = y[:, (groups - 1) * width:]
            extra = tail if extra is None else extra + tail
            groups -= 1
            y = y[:, : groups * width]
        half = groups // 2
        y = y[:, : half * width] + y[:, half * width:]
        groups = half
    if extra is not None:
        y = y + extra
    return y


def _gem_kernel(p_ref, x_ref, o_ref, *, eps, kH, W):
    # p_ref: (1,) float32 in SMEM (learnable GeM exponent)
    # x_ref: (TR, kH*W) block in VMEM -- lane-dense (pool window x width on lanes)
    # o_ref: (TR, W) block in VMEM
    p = p_ref[0]

    x = x_ref[...]
    cd = x.dtype                                    # pow in the input dtype (bf16-EUP friendly)
    # clamp(min=eps) ** p  ==  exp(p * log(max(x, eps)))   (base > 0 by the clamp)
    y = jnp.exp(p.astype(cd) * jnp.log(jnp.maximum(x, jnp.asarray(eps, dtype=cd))))

    # Window mean over the kH lane-groups, accumulated in f32.
    pooled = _fold_group_sum(y.astype(jnp.float32), kH, W) * (1.0 / kH)

    # Final ^(1/p) in f32 (pooled >= eps**p > 0, so log is safe); one small store.
    o_ref[...] = jnp.exp(jnp.log(pooled) * (1.0 / p)).astype(o_ref.dtype)


def _pick_row_block(R, D, itemsize, target_bytes=8 << 20):
    """Rows per tile (multiple of 8) giving ~target_bytes input tiles, capped to
    keep >= 2 (ideally >= 8) grid steps for megacore sharding / pipelining."""
    row_bytes = max(D, 128) * itemsize              # lanes pad up to 128
    tr = max(8, (target_bytes // row_bytes) // 8 * 8)
    for min_steps, min_tile in ((8, 2 << 20), (2, 0)):
        cap = (R // min_steps) // 8 * 8
        if cap >= 8 and cap * row_bytes >= min_tile:
            tr = min(tr, cap)
            break
    return max(8, min(tr, -(-R // 8) * 8))


def pnt_gem(x, p, *, kernel, eps=1e-6):
    """x: (N, C, H, W), p: (1,) float32.  Returns (N, C, H // kH, W)."""
    N, C, H, W = x.shape
    kH, kW = kernel
    assert kW == 1, "PNT_GeM uses kernel width 1"  # TODO(synk): kW > 1 pooling not implemented
    H_out = H // kH
    assert H_out >= 1, "pooling window larger than H"
    if H_out * kH != H:                             # PyTorch avg_pool2d floors: drop tail rows
        x = x[:, :, : H_out * kH, :]

    R, D = N * C * H_out, kH * W
    # Free row-major reshape: (N, C, H_out*kH, W) -> (N*C*H_out, kH*W).
    # No transpose / extra HBM pass; the pooled window lands on the lane axis.
    xr = x.reshape(R, D)

    itemsize = jnp.dtype(x.dtype).itemsize
    TR = _pick_row_block(R, D, itemsize)
    R_pad = -(-R // TR) * TR
    if R_pad != R:                                  # sublane/block padding (log-safe value 1.0)
        xr = jnp.pad(xr, ((0, R_pad - R), (0, 0)), constant_values=1.0)

    grid = (R_pad // TR,)
    kern = functools.partial(_gem_kernel, eps=eps, kH=kH, W=W)

    # Accurate advisory cost: no wrapper relayout passes any more.
    E = R * D
    cost = pl.CostEstimate(
        flops=3 * E,
        transcendentals=2 * E + 2 * R * W,
        bytes_accessed=(E + R * W) * itemsize,
    )

    out = pl.pallas_call(
        kern,
        out_shape=jax.ShapeDtypeStruct((R_pad, W), x.dtype),
        grid=grid,
        in_specs=[
            pl.BlockSpec(memory_space=pltpu.MemorySpace.SMEM),  # p (scalar parameter)
            pl.BlockSpec((TR, D), lambda i: (i, 0)),            # row-chunk of input
        ],
        out_specs=pl.BlockSpec((TR, W), lambda i: (i, 0)),
        compiler_params=pltpu.CompilerParams(
            dimension_semantics=("parallel",),      # row chunks are independent
            # Budget: ~8 MiB tile x2 (double buffer) + ~1 tile f32 post-pow temp
            # + small output.  Explicit limit covers v5e's 16 MiB scoped default
            # and stays under v7x's 64 MiB physical VMEM.
            vmem_limit_bytes=48 * 1024 * 1024,
        ),
        cost_estimate=cost,
    )(p, xr)

    if R_pad != R:
        out = out[:R]
    return out.reshape(N, C, H_out, W)


def pnt_gem_ref(x, p, *, kernel, eps=1e-6):
    """Pure-JAX reference matching F.avg_pool2d(clamp.pow(p), (kH,1)).pow(1/p)."""
    N, C, H, W = x.shape
    kH, kW = kernel
    H_out = H // kH
    x = x[:, :, : H_out * kH, :]
    y = jnp.power(jnp.maximum(x, eps), p[0])
    pooled = jnp.mean(y.reshape(N, C, H_out, kH, W), axis=3)
    return jnp.power(pooled, 1.0 / p[0])


if __name__ == "__main__":
    key = jax.random.PRNGKey(0)

    # Small shapes consistent with the module: pool over the full H axis
    # (the module's default kernel=(4096, 1) pools H completely; here H=16).
    N, C, H, W = 2, 4, 16, 16
    kernel = (16, 1)
    eps = 1e-6

    x = jax.random.normal(key, (N, C, H, W), dtype=jnp.float32)
    # Deterministic parameter init, matching nn.Parameter(torch.ones(1) * 3).
    p = jnp.ones((1,), dtype=jnp.float32) * 3.0

    out = pnt_gem(x, p, kernel=kernel, eps=eps)
    out = jax.block_until_ready(out)

    ref = pnt_gem_ref(x, p, kernel=kernel, eps=eps)
    assert out.shape == (N, C, H // kernel[0], W)
    assert jnp.allclose(out, ref, atol=1e-5, rtol=1e-5), float(jnp.max(jnp.abs(out - ref)))

    print("KERNEL_OK")
</pallas_src>

<mosaic_0001>
module attributes {stable_mosaic.version = 11 : i64} {
  func.func @_gem_kernel(%arg0: i32, %arg1: memref<1xf32, #tpu.memory_space<smem>>, %arg2: memref<8x256xf32, #tpu.memory_space<vmem>>, %arg3: memref<8x16xf32, #tpu.memory_space<vmem>>) attributes {dimension_semantics = [#tpu.dimension_semantics<parallel>], iteration_bounds = array<i64: 1>, scalar_prefetch = 0 : i64, scratch_operands = 0 : i64, tpu.core_type = #tpu.core_type<tc>, window_params = [{transform_indices = @transform_0, window_bounds = array<i64: 1>}, {transform_indices = @transform_1, window_bounds = array<i64: 8, 256>}, {transform_indices = @transform_2, window_bounds = array<i64: 8, 16>}]} {
    %c0 = arith.constant 0 : index
    %0 = memref.load %arg1[%c0] : memref<1xf32, #tpu.memory_space<smem>>
    %c0_0 = arith.constant 0 : index
    %c0_1 = arith.constant 0 : index
    %1 = vector.load %arg2[%c0_0, %c0_1] : memref<8x256xf32, #tpu.memory_space<vmem>>, vector<8x256xf32>
    %cst = arith.constant 9.99999997E-7 : f32
    %2 = vector.broadcast %cst : f32 to vector<8x256xf32>
    %3 = arith.maximumf %1, %2 : vector<8x256xf32>
    %4 = math.log %3 : vector<8x256xf32>
    %5 = vector.broadcast %0 : f32 to vector<8x256xf32>
    %6 = arith.mulf %5, %4 : vector<8x256xf32>
    %7 = math.exp %6 : vector<8x256xf32>
    %8 = vector.extract_strided_slice %7 {offsets = [0, 0], sizes = [8, 128], strides = [1, 1]} : vector<8x256xf32> to vector<8x128xf32>
    %9 = vector.extract_strided_slice %7 {offsets = [0, 128], sizes = [8, 128], strides = [1, 1]} : vector<8x256xf32> to vector<8x128xf32>
    %10 = arith.addf %8, %9 : vector<8x128xf32>
    %11 = vector.extract_strided_slice %10 {offsets = [0, 0], sizes = [8, 64], strides = [1, 1]} : vector<8x128xf32> to vector<8x64xf32>
    %12 = vector.extract_strided_slice %10 {offsets = [0, 64], sizes = [8, 64], strides = [1, 1]} : vector<8x128xf32> to vector<8x64xf32>
    %13 = arith.addf %11, %12 : vector<8x64xf32>
    %14 = vector.extract_strided_slice %13 {offsets = [0, 0], sizes = [8, 32], strides = [1, 1]} : vector<8x64xf32> to vector<8x32xf32>
    %15 = vector.extract_strided_slice %13 {offsets = [0, 32], sizes = [8, 32], strides = [1, 1]} : vector<8x64xf32> to vector<8x32xf32>
    %16 = arith.addf %14, %15 : vector<8x32xf32>
    %17 = vector.extract_strided_slice %16 {offsets = [0, 0], sizes = [8, 16], strides = [1, 1]} : vector<8x32xf32> to vector<8x16xf32>
    %18 = vector.extract_strided_slice %16 {offsets = [0, 16], sizes = [8, 16], strides = [1, 1]} : vector<8x32xf32> to vector<8x16xf32>
    %19 = arith.addf %17, %18 : vector<8x16xf32>
    %cst_2 = arith.constant 6.250000e-02 : f32
    %20 = vector.broadcast %cst_2 : f32 to vector<8x16xf32>
    %21 = arith.mulf %19, %20 : vector<8x16xf32>
    %22 = math.log %21 : vector<8x16xf32>
    %cst_3 = arith.constant 1.000000e+00 : f32
    %23 = arith.divf %cst_3, %0 : f32
    %24 = vector.broadcast %23 : f32 to vector<8x16xf32>
    %25 = arith.mulf %22, %24 : vector<8x16xf32>
    %26 = math.exp %25 : vector<8x16xf32>
    %c0_4 = arith.constant 0 : index
    %c0_5 = arith.constant 0 : index
    %27 = vector.load %arg3[%c0_4, %c0_5] : memref<8x16xf32, #tpu.memory_space<vmem>>, vector<8x16xf32>
    tpu.vector_store %arg3[%c0_4, %c0_5], %26 {strides = array<i32>} : memref<8x16xf32, #tpu.memory_space<vmem>>, vector<8x16xf32>,
    return
  }
  func.func @transform_0(%arg0: i32) -> i32 {
    %c0_i32 = arith.constant 0 : i32
    %c0_i32_0 = arith.constant 0 : i32
    return %c0_i32 : i32
  }
  func.func @transform_1(%arg0: i32) -> (i32, i32) {
    %c0_i32 = arith.constant 0 : i32
    %c0_i32_0 = arith.constant 0 : i32
    return %arg0, %c0_i32 : i32, i32
  }
  func.func @transform_2(%arg0: i32) -> (i32, i32) {
    %c0_i32 = arith.constant 0 : i32
    %c0_i32_0 = arith.constant 0 : i32
    return %arg0, %c0_i32 : i32, i32
  }
}

</mosaic_0001>

<bundles_post_ra>
// kernel: tpu_custom_call.1
= control target key start
LH: loop header
LB: loop body
LE: loop exit
PB: predicated region body
PF: predicated region fallthrough
CT: control target
= control target key end

     0   :  { %8 = vsyncpa [#allocation4], 0  ;;  %s178_s0 = inlined_call_operand.<no memory space> [shape: f32[1], index: 0, kind: input, shape index: {}]   ;;  %s179_s1 = inlined_call_operand.hbm [shape: f32[8,256], index: 1, kind: input, shape index: {}]   ;;  %s180_s2 = inlined_call_operand.hbm [shape: f32[8,16], index: 2, kind: output, shape index: {}]  }
   0x1   :  { %9 = vsyncpa [#allocation5], 0  ;;  %s149_s9 = smov [#allocation3]  }
   0x2   :  { %s18_s10 = sshll.u32 %s149_s9, 4  ;;  %s19_s10 = int_to_ptr.vmem [resolvable:$true] %s18_s10 }
   0x3   :  { %s113_s11 = scalar_lea.vmem %s19_s10, 256  ;;  %p118_p1 = scmp.lt.s32.totalorder %s19_s10, %s19_s10 }
   0x4   :  { %p114_p0 = scmp.ne.s32.totalorder %s19_s10, %s113_s11  ;;  %p119_p2 = scmp.lt.s32.totalorder %s113_s11, %s113_s11 }
   0x6   :  { %p120_p3 = por %p119_p2, %p118_p1 }
   0x8   :  { %p121_p4 = pnand %p120_p3, %p114_p0 }
   0xa   :  { %124 = shalt.err (!%p121_p4)
}
   0xb   :  { %21 = dma.hbm_to_vmem [thread:$0]  %s179_s1, 256, %s19_s10, [#allocation4]  }
   0xc   :  { %145 = dma.done.wait [#allocation4], 256  }
   0xd   :  { %146 = vsyncadd [#allocation4], 4294967040  ;;  %v26_v0 = vld [vmem:[#allocation3] sm:$0xff]  ;;  %v27_v1 = vld [vmem:[#allocation3 + $0x8] sm:$0xff]  ;;  %v34_v5 = vstv %s178_s0  ;;  %s150_s1 = smov 64   ;;  %s151_s16 = smov 96  }
   0xe   :  { %v28_v2 = vmax.f32 %v26_v0, 1e-06  ;;  %v29_v3 = vmax.f32 %v27_v1, 1e-06  ;;  %s152_s0 = smov 112   ;;  %s153_s18 = smov [#allocation6]  }
   0xf   :  { %s75_s19 = sshll.u32 %s153_s18, 4  ;;  %vm67_vm0 = vcmask 130048   ;;  %s76_s19 = int_to_ptr.vmem [resolvable:$true] %s75_s19 }
  0x10   :  { %91 = vlog2.f32 %v28_v2  ;;  %s125_s20 = scalar_lea.vmem %s76_s19, 128  ;;  %p130_p6 = scmp.lt.s32.totalorder %s76_s19, %s76_s19 }
  0x11   :  { %93 = vlog2.f32 %v29_v3  ;;  %p126_p5 = scmp.ne.s32.totalorder %s76_s19, %s125_s20  ;;  %p131_p7 = scmp.lt.s32.totalorder %s125_s20, %s125_s20 }
  0x13   :  { %p132_p8 = por %p131_p7, %p130_p6 }
  0x15   :  { %p133_p9 = pnand %p132_p8, %p126_p5 }
  0x1d   :  { %v92_v4 = vpop.eup %91 }
  0x1e   :  { %v94_v6 = vpop.eup %93  ;;  %v31_v7 = vmul.f32 0.6931472, %v92_v4 }
  0x1f   :  { %v33_v8 = vmul.f32 0.6931472, %v94_v6 }
  0x20   :  { %v35_v9 = vmul.f32 %v34_v5, %v31_v7 }
  0x21   :  { %v36_v10 = vmul.f32 %v34_v5, %v33_v8 }
  0x22   :  { %v37_v11 = vmul.f32 1.442695, %v35_v9 }
  0x23   :  { %v39_v12 = vmul.f32 1.442695, %v36_v10 }
  0x24   :  { %95 = vpow2.f32 %v37_v11 }
  0x25   :  { %97 = vpow2.f32 %v39_v12 }
  0x26   :  { %99 = vrcp.f32 %v34_v5 }
  0x31   :  { %v96_v13 = vpop.eup %95 }
  0x32   :  { %v98_v14 = vpop.eup %97 }
  0x33   :  { %v41_v15 = vadd.f32 %v98_v14, %v96_v13  ;;  %v100_v18 = vpop.eup %99 }
  0x34   :  { %84 = vpush %v100_v18 }
  0x35   :  { %43 = vrot.lane.b32.xlu0 %v41_v15, %s150_s1 }
  0x65   :  { %s85_s17 = spop %84 }
  0x66   :  { %v63_v25 = vstv %s85_s17 }
  0xa7   :  { %v44_v16 = vpop.permute.xlu0 %43 }
  0xa8   :  { %v46_v17 = vadd.f32 %v44_v16, %v41_v15 }
  0xaa   :  { %48 = vrot.lane.b32.xlu0 %v46_v17, %s151_s16 }
 0x11c   :  { %v49_v19 = vpop.permute.xlu0 %48 }
 0x11d   :  { %v51_v20 = vadd.f32 %v49_v19, %v46_v17 }
 0x11f   :  { %53 = vrot.lane.b32.xlu1 %v51_v20, %s152_s0 }
 0x191   :  { %v54_v21 = vpop.permute.xlu1 %53 }
 0x192   :  { %v56_v22 = vadd.f32 %v54_v21, %v51_v20 }
 0x194   :  { %v57_v23 = vmul.f32 0.0625, %v56_v22 }
 0x196   :  { %101 = vlog2.f32 %v57_v23 }
 0x1a3   :  { %v102_v24 = vpop.eup %101 }
 0x1a4   :  { %v59_v26 = vmul.f32 0.6931472, %v102_v24 }
 0x1a6   :  { %v64_v27 = vmul.f32 %v63_v25, %v59_v26 }
 0x1a8   :  { %v65_v28 = vmul.f32 1.442695, %v64_v27 }
 0x1aa   :  { %103 = vpow2.f32 %v65_v28 }
 0x1b7   :  { %v104_v29 = vpop.eup %103 }
 0x1b8   :  { %68 = vst.msk [vmem:[#allocation6] sm:$0xff] %vm67_vm0, %v104_v29 }
 0x1b9   :  { %136 = shalt.err (!%p133_p9)
}
 0x1ba   :  { %78 = dma.vmem_to_hbm [thread:$0]  %s76_s19, 128, %s180_s2, [#allocation5]  }
 0x1bb   :  { %147 = dma.done.wait [#allocation5], 128  }
 0x1bc   :  { %148 = vsyncadd [#allocation5], 4294967168 }
 0x1bd   :  { %82 = vsyncpa [#allocation4], 1 }
 0x1be   :  { %83 = vsyncpa [#allocation5], 1 }

</bundles_post_ra>
